<compile_context>
chip_gen: v7x
topology: tpu7x:2x2x1
jax: 0.10.0
libtpu: 0.0.40
codegen_flags: <defaults>
</compile_context>

<pallas_src>
import functools

import jax
import jax.numpy as jnp
from jax.experimental import pallas as pl
from jax.experimental.pallas import tpu as pltpu

NEG_SLOPE = 0.2   # LeakyReLU negative slope: the module explicitly uses 0.2


def _statnet_kernel(x_ref, z_ref, w1x_ref, w1z_ref, b1_ref,
                    w2_ref, b2_ref, w3_ref, b3_ref, w4_ref, b4_ref, o_ref):
    # layer 1: cat([x, z], -1) @ W1 + b1 as two MXU matmuls (no concat copy)
    h = (jnp.dot(x_ref[...], w1x_ref[...], preferred_element_type=jnp.float32)
         + jnp.dot(z_ref[...], w1z_ref[...], preferred_element_type=jnp.float32)
         + b1_ref[...])
    h = jnp.maximum(h, NEG_SLOPE * h)          # LeakyReLU(0.2): slope in (0, 1)
    h = jnp.dot(h, w2_ref[...], preferred_element_type=jnp.float32) + b2_ref[...]
    h = jnp.maximum(h, NEG_SLOPE * h)
    h = jnp.dot(h, w3_ref[...], preferred_element_type=jnp.float32) + b3_ref[...]
    h = jnp.maximum(h, NEG_SLOPE * h)
    # layer 4 (dim -> 1): VPU mul + XLU lane reduction; compact (TB, 1) store.
    o_ref[...] = jnp.sum(h * w4_ref[...], axis=1, keepdims=True) + b4_ref[0, 0]


def init_params(key, x_dim, z_feat_dim, dim):
    """PyTorch nn.Linear default init; weights stored transposed [in, out]."""
    z_dim = x_dim + z_feat_dim  # the first Linear's declared in_features

    def lin(k, fan_in, fan_out):
        k1, k2 = jax.random.split(k)
        bound = 1.0 / float(fan_in) ** 0.5
        w = jax.random.uniform(k1, (fan_in, fan_out), jnp.float32, -bound, bound)
        b = jax.random.uniform(k2, (1, fan_out), jnp.float32, -bound, bound)
        return w, b

    k1, k2, k3, k4 = jax.random.split(key, 4)
    w1, b1 = lin(k1, z_dim, dim)
    w2, b2 = lin(k2, dim, dim)
    w3, b3 = lin(k3, dim, dim)
    w4, b4 = lin(k4, dim, 1)
    return {
        'w1x': w1[:x_dim], 'w1z': w1[x_dim:], 'b1': b1,
        'w2': w2, 'b2': b2,
        'w3': w3, 'b3': b3,
        'w4': w4.T,                 # (1, dim) row vector for the final layer
        'b4': b4.reshape(1, 1),     # scalar bias, read from SMEM in the kernel
    }
    # TODO(synk): optional bf16 weight/activation path (keep f32 accumulation)
    # if the kernel ever becomes MXU-bound; kept f32 here for exact module fidelity.


@functools.partial(jax.jit, static_argnames=("block_rows",))
def statistics_network(params, x, z, *, block_rows=2048):
    """Equivalent of StatisticsNetwork.forward(x, z); returns shape x.shape[:-1]."""
    lead = x.shape[:-1]
    x2 = x.reshape(-1, x.shape[-1])
    z2 = z.reshape(-1, z.shape[-1])
    batch, x_dim = x2.shape
    zf_dim = z2.shape[1]
    dim = params['w2'].shape[0]

    if batch <= block_rows:
        tb = batch                       # single tile: block == full array dims
    else:
        assert block_rows % 128 == 0, "block_rows must be a multiple of 128"
        tb = block_rows                  # aligned tiles; last tile may be partial
    num_tiles = pl.cdiv(batch, tb)

    def row_tile(cols):                  # batch-tiled operands (x, z)
        return pl.BlockSpec((tb, cols), lambda i: (i, 0))

    def full(shape):                     # VMEM-resident weights (constant index)
        return pl.BlockSpec(shape, lambda i: (0, 0))

    out = pl.pallas_call(
        _statnet_kernel,
        out_shape=jax.ShapeDtypeStruct((batch, 1), jnp.float32),
        grid=(num_tiles,),
        in_specs=[
            row_tile(x_dim),                       # x tile        (tb, x_dim)
            row_tile(zf_dim),                      # z tile        (tb, zf_dim)
            full((x_dim, dim)),                    # W1[:x_dim]
            full((zf_dim, dim)),                   # W1[x_dim:]
            full((1, dim)),                        # b1
            full((dim, dim)), full((1, dim)),      # W2, b2
            full((dim, dim)), full((1, dim)),      # W3, b3
            full((1, dim)),                        # W4 row
            pl.BlockSpec(memory_space=pltpu.MemorySpace.SMEM),   # b4 scalar
        ],
        out_specs=pl.BlockSpec((tb, 1), lambda i: (i, 0)),
        compiler_params=pltpu.CompilerParams(
            dimension_semantics=("parallel",)),    # v7x: batch over both TCs
    )(x2, z2, params['w1x'], params['w1z'], params['b1'],
      params['w2'], params['b2'], params['w3'], params['b3'],
      params['w4'], params['b4'])
    return out.reshape(lead)


def _reference(params, x, z):
    """Pure-JAX reference of the PyTorch forward (for correctness check)."""
    hp = jax.lax.Precision.HIGHEST
    w1 = jnp.concatenate([params['w1x'], params['w1z']], axis=0)
    h = jnp.dot(jnp.concatenate([x, z], axis=-1), w1, precision=hp) + params['b1'][0]
    h = jnp.where(h >= 0, h, NEG_SLOPE * h)
    h = jnp.dot(h, params['w2'], precision=hp) + params['b2'][0]
    h = jnp.where(h >= 0, h, NEG_SLOPE * h)
    h = jnp.dot(h, params['w3'], precision=hp) + params['b3'][0]
    h = jnp.where(h >= 0, h, NEG_SLOPE * h)
    out = jnp.dot(h, params['w4'].T, precision=hp) + params['b4'][0, 0]
    return out[..., 0]


if __name__ == "__main__":
    X_DIM, Z_FEAT, DIM = 24, 8, 128   # cat -> z_dim = 32, hidden dim = 128

    key = jax.random.PRNGKey(0)
    kp, kx, kz = jax.random.split(key, 3)
    params = init_params(kp, X_DIM, Z_FEAT, DIM)

    # Small case: leading dims (2, 5) -> 10 rows, single tile (block == array).
    x = jax.random.normal(kx, (2, 5, X_DIM), jnp.float32)
    z = jax.random.normal(kz, (2, 5, Z_FEAT), jnp.float32)
    out = statistics_network(params, x, z)
    jax.block_until_ready(out)
    assert out.shape == (2, 5)
    assert bool(jnp.all(jnp.isfinite(out)))
    ref = _reference(params, x, z)
    assert bool(jnp.allclose(out, ref, atol=1e-4, rtol=1e-4))

    # Larger case exercising the batch grid + a partial last tile (300 = 2*128 + 44).
    kx2, kz2 = jax.random.split(kx)
    x_big = jax.random.normal(kx2, (300, X_DIM), jnp.float32)
    z_big = jax.random.normal(kz2, (300, Z_FEAT), jnp.float32)
    out_big = statistics_network(params, x_big, z_big, block_rows=128)
    jax.block_until_ready(out_big)
    assert out_big.shape == (300,)
    ref_big = _reference(params, x_big, z_big)
    assert bool(jnp.allclose(out_big, ref_big, atol=1e-4, rtol=1e-4))

    print("KERNEL_OK")
</pallas_src>

<mosaic_0001>
module attributes {stable_mosaic.version = 11 : i64} {
  func.func @_statnet_kernel(%arg0: i32, %arg1: memref<10x24xf32, #tpu.memory_space<vmem>>, %arg2: memref<10x8xf32, #tpu.memory_space<vmem>>, %arg3: memref<24x128xf32, #tpu.memory_space<vmem>>, %arg4: memref<8x128xf32, #tpu.memory_space<vmem>>, %arg5: memref<1x128xf32, #tpu.memory_space<vmem>>, %arg6: memref<128x128xf32, #tpu.memory_space<vmem>>, %arg7: memref<1x128xf32, #tpu.memory_space<vmem>>, %arg8: memref<128x128xf32, #tpu.memory_space<vmem>>, %arg9: memref<1x128xf32, #tpu.memory_space<vmem>>, %arg10: memref<1x128xf32, #tpu.memory_space<vmem>>, %arg11: memref<1x1xf32, #tpu.memory_space<smem>>, %arg12: memref<10x1xf32, #tpu.memory_space<vmem>>) attributes {dimension_semantics = [#tpu.dimension_semantics<parallel>], iteration_bounds = array<i64: 1>, scalar_prefetch = 0 : i64, scratch_operands = 0 : i64, tpu.core_type = #tpu.core_type<tc>, window_params = [{transform_indices = @transform_0, window_bounds = array<i64: 10, 24>}, {transform_indices = @transform_1, window_bounds = array<i64: 10, 8>}, {pipeline_mode = #tpu.pipeline_mode<synchronous>, transform_indices = @transform_2, window_bounds = array<i64: 24, 128>}, {pipeline_mode = #tpu.pipeline_mode<synchronous>, transform_indices = @transform_3, window_bounds = array<i64: 8, 128>}, {pipeline_mode = #tpu.pipeline_mode<synchronous>, transform_indices = @transform_4, window_bounds = array<i64: 1, 128>}, {pipeline_mode = #tpu.pipeline_mode<synchronous>, transform_indices = @transform_5, window_bounds = array<i64: 128, 128>}, {pipeline_mode = #tpu.pipeline_mode<synchronous>, transform_indices = @transform_6, window_bounds = array<i64: 1, 128>}, {pipeline_mode = #tpu.pipeline_mode<synchronous>, transform_indices = @transform_7, window_bounds = array<i64: 128, 128>}, {pipeline_mode = #tpu.pipeline_mode<synchronous>, transform_indices = @transform_8, window_bounds = array<i64: 1, 128>}, {pipeline_mode = #tpu.pipeline_mode<synchronous>, transform_indices = @transform_9, window_bounds = array<i64: 1, 128>}, {transform_indices = @transform_10, window_bounds = array<i64: 1, 1>}, {transform_indices = @transform_11, window_bounds = array<i64: 10, 1>}]} {
    %c0 = arith.constant 0 : index
    %c0_0 = arith.constant 0 : index
    %0 = vector.load %arg1[%c0, %c0_0] : memref<10x24xf32, #tpu.memory_space<vmem>>, vector<10x24xf32>
    %c0_1 = arith.constant 0 : index
    %c0_2 = arith.constant 0 : index
    %1 = vector.load %arg3[%c0_1, %c0_2] : memref<24x128xf32, #tpu.memory_space<vmem>>, vector<24x128xf32>
    %cst = arith.constant dense<0.000000e+00> : vector<10x128xf32>
    %2 = tpu.matmul %0, %1, %cst {dimension_numbers = #tpu.dot_dimension_numbers<[1], [0], [0], [1], [0, 0, 1, 1], [], []>} : vector<10x24xf32>, vector<24x128xf32>, vector<10x128xf32> -> vector<10x128xf32>
    %c0_3 = arith.constant 0 : index
    %c0_4 = arith.constant 0 : index
    %3 = vector.load %arg2[%c0_3, %c0_4] : memref<10x8xf32, #tpu.memory_space<vmem>>, vector<10x8xf32>
    %c0_5 = arith.constant 0 : index
    %c0_6 = arith.constant 0 : index
    %4 = vector.load %arg4[%c0_5, %c0_6] : memref<8x128xf32, #tpu.memory_space<vmem>>, vector<8x128xf32>
    %cst_7 = arith.constant dense<0.000000e+00> : vector<10x128xf32>
    %5 = tpu.matmul %3, %4, %cst_7 {dimension_numbers = #tpu.dot_dimension_numbers<[1], [0], [0], [1], [0, 0, 1, 1], [], []>} : vector<10x8xf32>, vector<8x128xf32>, vector<10x128xf32> -> vector<10x128xf32>
    %6 = arith.addf %2, %5 : vector<10x128xf32>
    %c0_8 = arith.constant 0 : index
    %c0_9 = arith.constant 0 : index
    %7 = vector.load %arg5[%c0_8, %c0_9] : memref<1x128xf32, #tpu.memory_space<vmem>>, vector<1x128xf32>
    %8 = vector.broadcast %7 : vector<1x128xf32> to vector<10x128xf32>
    %9 = arith.addf %6, %8 : vector<10x128xf32>
    %cst_10 = arith.constant 2.000000e-01 : f32
    %10 = vector.broadcast %cst_10 : f32 to vector<10x128xf32>
    %11 = arith.mulf %10, %9 : vector<10x128xf32>
    %12 = arith.maximumf %9, %11 : vector<10x128xf32>
    %c0_11 = arith.constant 0 : index
    %c0_12 = arith.constant 0 : index
    %13 = vector.load %arg6[%c0_11, %c0_12] : memref<128x128xf32, #tpu.memory_space<vmem>>, vector<128x128xf32>
    %cst_13 = arith.constant dense<0.000000e+00> : vector<10x128xf32>
    %14 = tpu.matmul %12, %13, %cst_13 {dimension_numbers = #tpu.dot_dimension_numbers<[1], [0], [0], [1], [0, 0, 1, 1], [], []>} : vector<10x128xf32>, vector<128x128xf32>, vector<10x128xf32> -> vector<10x128xf32>
    %c0_14 = arith.constant 0 : index
    %c0_15 = arith.constant 0 : index
    %15 = vector.load %arg7[%c0_14, %c0_15] : memref<1x128xf32, #tpu.memory_space<vmem>>, vector<1x128xf32>
    %16 = vector.broadcast %15 : vector<1x128xf32> to vector<10x128xf32>
    %17 = arith.addf %14, %16 : vector<10x128xf32>
    %cst_16 = arith.constant 2.000000e-01 : f32
    %18 = vector.broadcast %cst_16 : f32 to vector<10x128xf32>
    %19 = arith.mulf %18, %17 : vector<10x128xf32>
    %20 = arith.maximumf %17, %19 : vector<10x128xf32>
    %c0_17 = arith.constant 0 : index
    %c0_18 = arith.constant 0 : index
    %21 = vector.load %arg8[%c0_17, %c0_18] : memref<128x128xf32, #tpu.memory_space<vmem>>, vector<128x128xf32>
    %cst_19 = arith.constant dense<0.000000e+00> : vector<10x128xf32>
    %22 = tpu.matmul %20, %21, %cst_19 {dimension_numbers = #tpu.dot_dimension_numbers<[1], [0], [0], [1], [0, 0, 1, 1], [], []>} : vector<10x128xf32>, vector<128x128xf32>, vector<10x128xf32> -> vector<10x128xf32>
    %c0_20 = arith.constant 0 : index
    %c0_21 = arith.constant 0 : index
    %23 = vector.load %arg9[%c0_20, %c0_21] : memref<1x128xf32, #tpu.memory_space<vmem>>, vector<1x128xf32>
    %24 = vector.broadcast %23 : vector<1x128xf32> to vector<10x128xf32>
    %25 = arith.addf %22, %24 : vector<10x128xf32>
    %cst_22 = arith.constant 2.000000e-01 : f32
    %26 = vector.broadcast %cst_22 : f32 to vector<10x128xf32>
    %27 = arith.mulf %26, %25 : vector<10x128xf32>
    %28 = arith.maximumf %25, %27 : vector<10x128xf32>
    %c0_23 = arith.constant 0 : index
    %c0_24 = arith.constant 0 : index
    %29 = vector.load %arg10[%c0_23, %c0_24] : memref<1x128xf32, #tpu.memory_space<vmem>>, vector<1x128xf32>
    %30 = vector.broadcast %29 : vector<1x128xf32> to vector<10x128xf32>
    %31 = arith.mulf %28, %30 : vector<10x128xf32>
    %cst_25 = arith.constant dense<0.000000e+00> : vector<10xf32>
    %32 = vector.multi_reduction <add>, %31, %cst_25 [1] : vector<10x128xf32> to vector<10xf32>
    %33 = vector.shape_cast %32 : vector<10xf32> to vector<10x1xf32>
    %c0_26 = arith.constant 0 : index
    %c0_27 = arith.constant 0 : index
    %34 = memref.load %arg11[%c0_26, %c0_27] : memref<1x1xf32, #tpu.memory_space<smem>>
    %35 = vector.broadcast %34 : f32 to vector<10x1xf32>
    %36 = arith.addf %33, %35 : vector<10x1xf32>
    %c0_28 = arith.constant 0 : index
    %c0_29 = arith.constant 0 : index
    %37 = vector.load %arg12[%c0_28, %c0_29] : memref<10x1xf32, #tpu.memory_space<vmem>>, vector<10x1xf32>
    tpu.vector_store %arg12[%c0_28, %c0_29], %36 {strides = array<i32>} : memref<10x1xf32, #tpu.memory_space<vmem>>, vector<10x1xf32>,
    return
  }
  func.func @transform_0(%arg0: i32) -> (i32, i32) {
    %c0_i32 = arith.constant 0 : i32
    %c0_i32_0 = arith.constant 0 : i32
    return %arg0, %c0_i32 : i32, i32
  }
  func.func @transform_1(%arg0: i32) -> (i32, i32) {
    %c0_i32 = arith.constant 0 : i32
    %c0_i32_0 = arith.constant 0 : i32
    return %arg0, %c0_i32 : i32, i32
  }
  func.func @transform_2(%arg0: i32) -> (i32, i32) {
    %c0_i32 = arith.constant 0 : i32
    %c0_i32_0 = arith.constant 0 : i32
    %c0_i32_1 = arith.constant 0 : i32
    return %c0_i32, %c0_i32_0 : i32, i32
  }
  func.func @transform_3(%arg0: i32) -> (i32, i32) {
    %c0_i32 = arith.constant 0 : i32
    %c0_i32_0 = arith.constant 0 : i32
    %c0_i32_1 = arith.constant 0 : i32
    return %c0_i32, %c0_i32_0 : i32, i32
  }
  func.func @transform_4(%arg0: i32) -> (i32, i32) {
    %c0_i32 = arith.constant 0 : i32
    %c0_i32_0 = arith.constant 0 : i32
    %c0_i32_1 = arith.constant 0 : i32
    return %c0_i32, %c0_i32_0 : i32, i32
  }
  func.func @transform_5(%arg0: i32) -> (i32, i32) {
    %c0_i32 = arith.constant 0 : i32
    %c0_i32_0 = arith.constant 0 : i32
    %c0_i32_1 = arith.constant 0 : i32
    return %c0_i32, %c0_i32_0 : i32, i32
  }
  func.func @transform_6(%arg0: i32) -> (i32, i32) {
    %c0_i32 = arith.constant 0 : i32
    %c0_i32_0 = arith.constant 0 : i32
    %c0_i32_1 = arith.constant 0 : i32
    return %c0_i32, %c0_i32_0 : i32, i32
  }
  func.func @transform_7(%arg0: i32) -> (i32, i32) {
    %c0_i32 = arith.constant 0 : i32
    %c0_i32_0 = arith.constant 0 : i32
    %c0_i32_1 = arith.constant 0 : i32
    return %c0_i32, %c0_i32_0 : i32, i32
  }
  func.func @transform_8(%arg0: i32) -> (i32, i32) {
    %c0_i32 = arith.constant 0 : i32
    %c0_i32_0 = arith.constant 0 : i32
    %c0_i32_1 = arith.constant 0 : i32
    return %c0_i32, %c0_i32_0 : i32, i32
  }
  func.func @transform_9(%arg0: i32) -> (i32, i32) {
    %c0_i32 = arith.constant 0 : i32
    %c0_i32_0 = arith.constant 0 : i32
    %c0_i32_1 = arith.constant 0 : i32
    return %c0_i32, %c0_i32_0 : i32, i32
  }
  func.func @transform_10(%arg0: i32) -> (i32, i32) {
    %c0_i32 = arith.constant 0 : i32
    %c0_i32_0 = arith.constant 0 : i32
    %c0_i32_1 = arith.constant 0 : i32
    return %c0_i32, %c0_i32_0 : i32, i32
  }
  func.func @transform_11(%arg0: i32) -> (i32, i32) {
    %c0_i32 = arith.constant 0 : i32
    %c0_i32_0 = arith.constant 0 : i32
    return %arg0, %c0_i32 : i32, i32
  }
}

</mosaic_0001>

<bundles_post_ra>
// kernel: statistics_network.1
= control target key start
LH: loop header
LB: loop body
LE: loop exit
PB: predicated region body
PF: predicated region fallthrough
CT: control target
= control target key end

     0   :  { %17 = vsyncpa [#allocation4], 0  ;;  %s1053_s0 = inlined_call_operand.vmem [shape: f32[10,24], index: 0, kind: input, shape index: {}]   ;;  %s1054_s1 = inlined_call_operand.vmem [shape: f32[10,8], index: 1, kind: input, shape index: {}]   ;;  %s1055_s2 = inlined_call_operand.hbm [shape: f32[24,128], index: 2, kind: input, shape index: {}]   ;;  %s1056_s3 = inlined_call_operand.hbm [shape: f32[8,128], index: 3, kind: input, shape index: {}]   ;;  %s1057_s4 = inlined_call_operand.vmem [shape: f32[1,128], index: 4, kind: input, shape index: {}]   ;;  %s1058_s5 = inlined_call_operand.vmem [shape: f32[128,128], index: 5, kind: input, shape index: {}]   ;;  %s1059_s6 = inlined_call_operand.vmem [shape: f32[1,128], index: 6, kind: input, shape index: {}]   ;;  %s1060_s7 = inlined_call_operand.hbm [shape: f32[128,128], index: 7, kind: input, shape index: {}]   ;;  %s1061_s8 = inlined_call_operand.hbm [shape: f32[1,128], index: 8, kind: input, shape index: {}]   ;;  %s1062_s9 = inlined_call_operand.hbm [shape: f32[1,128], index: 9, kind: input, shape index: {}]   ;;  %s1063_s10 = inlined_call_operand.<no memory space> [shape: f32[1,1], index: 10, kind: input, shape index: {}]   ;;  %s1064_s11 = inlined_call_operand.vmem [shape: f32[10,1], index: 11, kind: output, shape index: {}]  }
   0x1   :  { %18 = vsyncpa [#allocation6], 0 }
   0x2   :  { %19 = vsyncpa [#allocation9], 0  ;;  %s849_s17 = smov [#allocation5]   ;;  %s850_s19 = smov [#allocation8]  }
   0x3   :  { %s42_s18 = sshll.u32 %s849_s17, 4  ;;  %s70_s20 = sshll.u32 %s850_s19, 4  ;;  %s43_s18 = int_to_ptr.vmem [resolvable:$true] %s42_s18  ;;  %s71_s20 = int_to_ptr.vmem [resolvable:$true] %s70_s20 }
   0x4   :  { %s733_s23 = scalar_lea.hbm %s1056_s3, 128 }
   0x5   :  { %p734_p0 = scmp.ne.s32.totalorder %s1056_s3, %s733_s23  ;;  %p737_p1 = scmp.lt.u32.totalorder %s733_s23, %s1056_s3 }
   0x7   :  { %p739_p2 = pnand %p737_p1, %p734_p0 }
   0x9   :  { %742 = shalt.err (!%p739_p2)
}
   0xa   :  { %s743_s28 = scalar_lea.vmem %s43_s18, 128  ;;  %p748_p4 = scmp.lt.s32.totalorder %s43_s18, %s43_s18 }
   0xb   :  { %p744_p3 = scmp.ne.s32.totalorder %s43_s18, %s743_s28  ;;  %p749_p5 = scmp.lt.s32.totalorder %s743_s28, %s743_s28 }
   0xd   :  { %p750_p6 = por %p749_p5, %p748_p4 }
   0xf   :  { %p751_p7 = pnand %p750_p6, %p744_p3 }
  0x11   :  { %754 = shalt.err (!%p751_p7)
}
  0x12   :  { %45 = dma.hbm_to_vmem [thread:$0]  %s1056_s3, 128, %s43_s18, [#allocation6]  }
  0x13   :  { %s755_s14 = scalar_lea.hbm %s1061_s8, 16 }
  0x14   :  { %p756_p8 = scmp.ne.s32.totalorder %s1061_s8, %s755_s14  ;;  %p759_p9 = scmp.lt.u32.totalorder %s755_s14, %s1061_s8 }
  0x16   :  { %p761_p10 = pnand %p759_p9, %p756_p8 }
  0x18   :  { %764 = shalt.err (!%p761_p10)
}
  0x19   :  { %s765_s21 = scalar_lea.vmem %s71_s20, 16  ;;  %s769_s22 = scalar_lea.vmem %s71_s20, 32 }
  0x1a   :  { %p766_p11 = scmp.ne.s32.totalorder %s71_s20, %s765_s21  ;;  %p770_p12 = scmp.lt.s32.totalorder %s71_s20, %s71_s20 }
  0x1b   :  { %p771_p13 = scmp.lt.s32.totalorder %s769_s22, %s765_s21 }
  0x1d   :  { %p772_p0 = por %p771_p13, %p770_p12 }
  0x1f   :  { %p773_p1 = pnand %p772_p0, %p766_p11 }
  0x21   :  { %776 = shalt.err (!%p773_p1)
}
  0x22   :  { %73 = dma.hbm_to_vmem [thread:$0]  %s1061_s8, 16, %s71_s20, [#allocation9]  }
  0x23   :  { %s851_s23 = smov [#allocation3]   ;;  %s777_s27 = scalar_lea.hbm %s1055_s2, 384 }
  0x24   :  { %s29_s24 = sshll.u32 %s851_s23, 4  ;;  %p778_p2 = scmp.ne.s32.totalorder %s1055_s2, %s777_s27  ;;  %s30_s24 = int_to_ptr.vmem [resolvable:$true] %s29_s24 }
  0x25   :  { %p781_p3 = scmp.lt.u32.totalorder %s777_s27, %s1055_s2 }
  0x27   :  { %p783_p4 = pnand %p781_p3, %p778_p2 }
  0x29   :  { %786 = shalt.err (!%p783_p4)
}
  0x2a   :  { %s787_s13 = scalar_lea.vmem %s30_s24, 384  ;;  %p792_p6 = scmp.lt.s32.totalorder %s30_s24, %s30_s24 }
  0x2b   :  { %p788_p5 = scmp.ne.s32.totalorder %s30_s24, %s787_s13  ;;  %p793_p7 = scmp.lt.s32.totalorder %s787_s13, %s787_s13 }
  0x2d   :  { %p794_p8 = por %p793_p7, %p792_p6 }
  0x2f   :  { %p795_p9 = pnand %p794_p8, %p788_p5 }
  0x31   :  { %798 = shalt.err (!%p795_p9)
}
  0x32   :  { %s852_s8 = smov 128   ;;  %s853_s20 = smov 8  }
  0x33   :  { %35 = dma.hbm_to_vmem [thread:$0]  %s1055_s2, 384, %s30_s24, [#allocation4], %s852_s8, %s852_s8, %s853_s20  }
  0x34   :  { %s854_s16 = smov [#allocation7]   ;;  %s855_s19 = smov [#allocation10]  }
  0x35   :  { %s57_s17 = sshll.u32 %s854_s16, 4  ;;  %s80_s21 = sshll.u32 %s855_s19, 4  ;;  %s58_s17 = int_to_ptr.vmem [resolvable:$true] %s57_s17  ;;  %s81_s21 = int_to_ptr.vmem [resolvable:$true] %s80_s21 }
  0x36   :  { %s799_s18 = scalar_lea.hbm %s1060_s7, 2048 }
  0x37   :  { %p800_p10 = scmp.ne.s32.totalorder %s1060_s7, %s799_s18  ;;  %p803_p11 = scmp.lt.u32.totalorder %s799_s18, %s1060_s7 }
  0x39   :  { %p805_p12 = pnand %p803_p11, %p800_p10 }
  0x3b   :  { %808 = shalt.err (!%p805_p12)
}
  0x3c   :  { %s809_s2 = scalar_lea.vmem %s58_s17, 2048  ;;  %p814_p0 = scmp.lt.s32.totalorder %s58_s17, %s58_s17 }
  0x3d   :  { %p810_p13 = scmp.ne.s32.totalorder %s58_s17, %s809_s2  ;;  %p815_p1 = scmp.lt.s32.totalorder %s809_s2, %s809_s2 }
  0x3f   :  { %p816_p2 = por %p815_p1, %p814_p0 }
  0x41   :  { %p817_p3 = pnand %p816_p2, %p810_p13 }
  0x43   :  { %820 = shalt.err (!%p817_p3)
}
  0x44   :  { %63 = dma.hbm_to_vmem [thread:$0]  %s1060_s7, 2048, %s58_s17, [#allocation6], %s852_s8, %s852_s8, %s853_s20  }
  0x45   :  { %s821_s12 = scalar_lea.hbm %s1062_s9, 16 }
  0x46   :  { %p822_p4 = scmp.ne.s32.totalorder %s1062_s9, %s821_s12  ;;  %p825_p5 = scmp.lt.u32.totalorder %s821_s12, %s1062_s9 }
  0x48   :  { %p827_p6 = pnand %p825_p5, %p822_p4 }
  0x4a   :  { %830 = shalt.err (!%p827_p6)
}
  0x4b   :  { %s831_s19 = scalar_lea.vmem %s81_s21, 16  ;;  %s835_s22 = scalar_lea.vmem %s81_s21, 32 }
  0x4c   :  { %p832_p7 = scmp.ne.s32.totalorder %s81_s21, %s831_s19  ;;  %p836_p8 = scmp.lt.s32.totalorder %s81_s21, %s81_s21 }
  0x4d   :  { %p837_p9 = scmp.lt.s32.totalorder %s835_s22, %s831_s19 }
  0x4f   :  { %p838_p10 = por %p837_p9, %p836_p8 }
  0x51   :  { %p839_p11 = pnand %p838_p10, %p832_p7 }
  0x53   :  { %842 = shalt.err (!%p839_p11)
}
  0x54   :  { %83 = dma.hbm_to_vmem [thread:$0]  %s1062_s9, 16, %s81_s21, [#allocation9]  }
  0x55   :  { %843 = dma.done.wait [#allocation4], 384  }
  0x56   :  { %844 = vsyncadd [#allocation4], 4294966912 }
  0x57   :  { %845 = dma.done.wait [#allocation6], 2176  }
  0x58   :  { %846 = vsyncadd [#allocation6], 4294965120 }
  0x59   :  { %847 = dma.done.wait [#allocation9], 32  }
  0x5a   :  { %848 = vsyncadd [#allocation9], 4294967264  ;;  %vm109_vm0 = vcmask 64512   ;;  %v103_v0 = vld [vmem:[#allocation3] sm:$0xff]  ;;  %v104_v1 = vld [vmem:[#allocation3 + $0x8] sm:$0xff]  ;;  %vm191_vm1 = vcmask 195584  }
  0x5b   :  { %v108_v2 = vld [vmem:[#allocation5] sm:$0xff]  ;;  %v656_v3 = vpack.c.bf16 %v104_v1, %v103_v0  ;;  %v106_v4 = vld [vmem:[%s1054_s1] sm:$0xff]  ;;  %v107_v5 = vld [vmem:[%s1054_s1 + $0x8] sm:$0x3]  ;;  %vm501_vm2 = vcmask 1041408   ;;  %vm509_vm3 = vcmask 7168  }
  0x5c   :  { %572 = vmatprep.subr.mxu1 %v108_v2  ;;  %574 = vmatprep.mubr.msk.f32.mxu1 %vm109_vm0, %v106_v4  ;;  %v105_v6 = vld [vmem:[#allocation3 + $0x10] sm:$0xff]  ;;  %v101_v7 = vld [vmem:[%s1053_s0] sm:$0xff]  ;;  %v287_v9 = vld [vmem:[%s1058_s5 + $0x8] sm:$0xff]  ;;  %vm511_vm4 = vcmask 1024  }
  0x5d   :  { %573 = vmatpush3.msra.mxu1 %v108_v2  ;;  %v286_v8 = vld [vmem:[%s1058_s5] sm:$0xff]  ;;  %657 = vmatprep.subr.bf16.mxu0 %v656_v3  ;;  %v288_v10 = vld [vmem:[%s1058_s5 + $0x10] sm:$0xff]  ;;  %v289_v11 = vld [vmem:[%s1058_s5 + $0x18] sm:$0xff] }
  0x5e   :  { %575 = vmatmul.mubr.msk.f32.vlgmr.msra.gmra.mrb[0].mxu1 %vm109_vm0, %v107_v5  ;;  %659 = vmatpush3.bf16.msra.mxu0 %v656_v3  ;;  %v660_v12 = vpack.c.bf16 %v287_v9, %v286_v8  ;;  %v664_v13 = vpack.c.bf16 %v289_v11, %v288_v10  ;;  %v290_v14 = vld [vmem:[%s1058_s5 + $0x20] sm:$0xff]  ;;  %v291_v15 = vld [vmem:[%s1058_s5 + $0x28] sm:$0xff]  ;;  %v292_v18 = vld [vmem:[%s1058_s5 + $0x30] sm:$0xff] }
  0x5f   :  { %583 = vmatprep.mubr.msk.f32.mxu0 %vm191_vm1, %v101_v7  ;;  %581 = vmatprep.subr.mxu0 %v105_v6  ;;  %v102_v16 = vld [vmem:[%s1053_s0 + $0x8] sm:$0x3]  ;;  %v668_v17 = vpack.c.bf16 %v291_v15, %v290_v14  ;;  %v293_v19 = vld [vmem:[%s1058_s5 + $0x38] sm:$0xff]  ;;  %v294_v21 = vld [vmem:[%s1058_s5 + $0x40] sm:$0xff] }
  0x60   :  { %661 = vmatprep.subr.bf16.mxu1 %v660_v12  ;;  %v672_v20 = vpack.c.bf16 %v293_v19, %v292_v18  ;;  %v295_v22 = vld [vmem:[%s1058_s5 + $0x48] sm:$0xff]  ;;  %v296_v24 = vld [vmem:[%s1058_s5 + $0x50] sm:$0xff]  ;;  %v297_v25 = vld [vmem:[%s1058_s5 + $0x58] sm:$0xff] }
  0x61   :  { %663 = vmatpush3.bf16.msra.mxu1 %v660_v12  ;;  %v676_v23 = vpack.c.bf16 %v295_v22, %v294_v21  ;;  %v680_v26 = vpack.c.bf16 %v297_v25, %v296_v24  ;;  %v298_v27 = vld [vmem:[%s1058_s5 + $0x60] sm:$0xff]  ;;  %v299_v28 = vld [vmem:[%s1058_s5 + $0x68] sm:$0xff]  ;;  %v300_v30 = vld [vmem:[%s1058_s5 + $0x70] sm:$0xff] }
  0x62   :  { %582 = vmatpush3.msra.mxu0 %v105_v6  ;;  %665 = vmatprep.subr.bf16.mxu1 %v664_v13  ;;  %v684_v29 = vpack.c.bf16 %v299_v28, %v298_v27  ;;  %v301_v31 = vld [vmem:[%s1058_s5 + $0x78] sm:$0xff]  ;;  %v388_v33 = vld [vmem:[#allocation7] sm:$0xff]  ;;  %v389_v34 = vld [vmem:[#allocation7 + $0x8] sm:$0xff]  ;;  %v506_v28 = vstv %s1063_s10 }
  0x63   :  { %584 = vmatmul.mubr.msk.f32.vlgmr.msra.gmra.mrb[0].mxu0 %vm191_vm1, %v102_v16  ;;  %v688_v32 = vpack.c.bf16 %v301_v31, %v300_v30  ;;  %v390_v35 = vld [vmem:[#allocation7 + $0x10] sm:$0xff]  ;;  %v692_v36 = vpack.c.bf16 %v389_v34, %v388_v33  ;;  %v391_v37 = vld [vmem:[#allocation7 + $0x18] sm:$0xff]  ;;  %v392_v39 = vld [vmem:[#allocation7 + $0x20] sm:$0xff] }
  0x64   :  { %v696_v38 = vpack.c.bf16 %v391_v37, %v390_v35  ;;  %v393_v40 = vld [vmem:[#allocation7 + $0x28] sm:$0xff]  ;;  %v394_v42 = vld [vmem:[#allocation7 + $0x30] sm:$0xff]  ;;  %v395_v43 = vld [vmem:[#allocation7 + $0x38] sm:$0xff] }
  0x65   :  { %667 = vmatpush3.bf16.msra.mxu1 %v664_v13  ;;  %693 = vmatprep.subr.bf16.mxu0 %v692_v36  ;;  %v700_v41 = vpack.c.bf16 %v393_v40, %v392_v39  ;;  %v704_v44 = vpack.c.bf16 %v395_v43, %v394_v42  ;;  %v396_v45 = vld [vmem:[#allocation7 + $0x40] sm:$0xff]  ;;  %v397_v46 = vld [vmem:[#allocation7 + $0x48] sm:$0xff]  ;;  %v398_v48 = vld [vmem:[#allocation7 + $0x50] sm:$0xff] }
  0x66   :  { %669 = vmatprep.subr.bf16.mxu1 %v668_v17  ;;  %695 = vmatpush3.bf16.msra.mxu0 %v692_v36  ;;  %v708_v47 = vpack.c.bf16 %v397_v46, %v396_v45  ;;  %v399_v49 = vld [vmem:[#allocation7 + $0x58] sm:$0xff]  ;;  %v524_v54 = vld [vmem:[%s1057_s4] ss:$0 sm:$0xff]  ;;  %v401_v1 = vld [vmem:[#allocation7 + $0x68] sm:$0xff] }
  0x67   :  { %697 = vmatprep.subr.bf16.mxu0 %v696_v38  ;;  %v712_v50 = vpack.c.bf16 %v399_v49, %v398_v48  ;;  %v400_v0 = vld [vmem:[#allocation7 + $0x60] sm:$0xff]  ;;  %v402_v3 = vld [vmem:[#allocation7 + $0x70] sm:$0xff]  ;;  %v403_v4 = vld [vmem:[#allocation7 + $0x78] sm:$0xff] }
  0x68   :  { %v716_v2 = vpack.c.bf16 %v401_v1, %v400_v0  ;;  %v720_v5 = vpack.c.bf16 %v403_v4, %v402_v3  ;;  %v525_v6 = vld [vmem:[%s1059_s6] ss:$0 sm:$0xff] }
  0x69   :  { %671 = vmatpush3.bf16.msra.mxu1 %v668_v17  ;;  %v526_v15 = vld [vmem:[#allocation8] ss:$0 sm:$0xff] }
  0x6a   :  { %673 = vmatprep.subr.bf16.mxu1 %v672_v20  ;;  %699 = vmatpush3.bf16.msra.mxu0 %v696_v38 }
  0x6b   :  { %701 = vmatprep.subr.bf16.mxu0 %v700_v41 }
  0x6d   :  { %675 = vmatpush3.bf16.msra.mxu1 %v672_v20 }
  0x6e   :  { %677 = vmatprep.subr.bf16.mxu1 %v676_v23  ;;  %703 = vmatpush3.bf16.msra.mxu0 %v700_v41 }
  0x6f   :  { %705 = vmatprep.subr.bf16.mxu0 %v704_v44 }
  0x71   :  { %679 = vmatpush3.bf16.msra.mxu1 %v676_v23  ;;  %v527_v23 = vld [vmem:[#allocation10] ss:$0 sm:$0xff] }
  0x72   :  { %681 = vmatprep.subr.bf16.mxu1 %v680_v26  ;;  %707 = vmatpush3.bf16.msra.mxu0 %v704_v44 }
  0x73   :  { %709 = vmatprep.subr.bf16.mxu0 %v708_v47 }
  0x75   :  { %683 = vmatpush3.bf16.msra.mxu1 %v680_v26 }
  0x76   :  { %685 = vmatprep.subr.bf16.mxu1 %v684_v29  ;;  %711 = vmatpush3.bf16.msra.mxu0 %v708_v47 }
  0x77   :  { %713 = vmatprep.subr.bf16.mxu0 %v712_v50 }
  0x79   :  { %687 = vmatpush3.bf16.msra.mxu1 %v684_v29 }
  0x7a   :  { %689 = vmatprep.subr.bf16.mxu1 %v688_v32  ;;  %715 = vmatpush3.bf16.msra.mxu0 %v712_v50 }
  0x7b   :  { %717 = vmatprep.subr.bf16.mxu0 %v716_v2 }
  0x7d   :  { %691 = vmatpush3.bf16.msra.mxu1 %v688_v32 }
  0x7e   :  { %719 = vmatpush3.bf16.msra.mxu0 %v716_v2 }
  0x7f   :  { %721 = vmatprep.subr.bf16.mxu0 %v720_v5 }
  0x82   :  { %723 = vmatpush3.bf16.msra.mxu0 %v720_v5 }
 0x131   :  { %v576_v51 = vpop.f32.mrb[0].mxu1 }
 0x132   :  { %v182_v52 = vpop.f32.mrb[1].mxu1 }
 0x136   :  { %v585_v53 = vpop.f32.mrb[0].mxu0 }
 0x137   :  { %v270_v55 = vadd.f32 %v585_v53, %v576_v51  ;;  %v264_v56 = vpop.f32.mrb[1].mxu0 }
 0x138   :  { %v265_v57 = vadd.f32 %v264_v56, %v182_v52 }
 0x139   :  { %v281_v58 = vadd.f32 %v524_v54, %v270_v55 }
 0x13a   :  { %v280_v59 = vadd.f32 %v524_v54, %v265_v57 }
 0x13b   :  { %v283_v60 = vmul.f32 0.2, %v281_v58 }
 0x13c   :  { %v282_v61 = vmul.f32 0.2, %v280_v59 }
 0x13d   :  { %v285_v63 = vmax.f32 %v281_v58, %v283_v60 }
 0x13e   :  { %v284_v62 = vmax.f32 %v280_v59, %v282_v61 }
 0x140   :  { %618 = vmatprep.mubr.f32.mxu1 %v284_v62 }
 0x141   :  { %619 = vmatmul.mubr.f32.vlgmr.msra.gmra.mrb[2].mxu1 %v285_v63 }
 0x214   :  { %v620_v7 = vpop.f32.mrb[2].mxu1 }
 0x215   :  { %v381_v8 = vadd.f32 %v620_v7, %v525_v6  ;;  %v375_v9 = vpop.f32.mrb[3].mxu1 }
 0x216   :  { %v376_v10 = vadd.f32 %v525_v6, %v375_v9 }
 0x217   :  { %v385_v11 = vmul.f32 0.2, %v381_v8 }
 0x218   :  { %v384_v12 = vmul.f32 0.2, %v376_v10 }
 0x219   :  { %v387_v14 = vmax.f32 %v381_v8, %v385_v11 }
 0x21a   :  { %v386_v13 = vmax.f32 %v376_v10, %v384_v12 }
 0x21c   :  { %653 = vmatprep.mubr.f32.mxu0 %v386_v13 }
 0x21d   :  { %654 = vmatmul.mubr.f32.vlgmr.msra.gmra.mrb[2].mxu0 %v387_v14 }
 0x2f0   :  { %v655_v16 = vpop.f32.mrb[2].mxu0 }
 0x2f1   :  { %v483_v17 = vadd.f32 %v655_v16, %v526_v15  ;;  %v477_v18 = vpop.f32.mrb[3].mxu0 }
 0x2f2   :  { %v478_v19 = vadd.f32 %v526_v15, %v477_v18 }
 0x2f3   :  { %v487_v20 = vmul.f32 0.2, %v483_v17 }
 0x2f4   :  { %v486_v21 = vmul.f32 0.2, %v478_v19 }
 0x2f5   :  { %v489_v22 = vmax.f32 %v483_v17, %v487_v20 }
 0x2f6   :  { %v488_v24 = vmax.f32 %v478_v19, %v486_v21 }
 0x2f7   :  { %v498_v26 = vmul.f32 %v527_v23, %v489_v22 }
 0x2f8   :  { %v497_v25 = vmul.f32 %v527_v23, %v488_v24 }
 0x2f9   :  { %v502_v27 = vsel %vm501_vm2, %v498_v26, 0.0 }
 0x2fa   :  { %499 = vadd.xlane.f32.xlu0 %v497_v25 }
 0x2fe   :  { %503 = vadd.xlane.f32.xlu0 %v502_v27 }
 0x387   :  { %v500_v29 = vpop.xlane.xlu0 %499 }
 0x388   :  { %v507_v30 = vadd.f32 %v506_v28, %v500_v29 }
 0x38a   :  { %510 = vst.msk [vmem:[%s1064_s11] sm:$0xff] %vm509_vm3, %v507_v30 }
 0x38b   :  { %v504_v31 = vpop.xlane.xlu0 %503 }
 0x38c   :  { %v508_v32 = vadd.f32 %v506_v28, %v504_v31 }
 0x38e   :  { %512 = vst.msk [vmem:[%s1064_s11 + $0x8] sm:$0x3] %vm511_vm4, %v508_v32 }
 0x38f   :  { %517 = vsyncpa [#allocation4], 1 }
 0x390   :  { %518 = vsyncpa [#allocation6], 1 }
 0x391   :  { %519 = vsyncpa [#allocation9], 1 }

</bundles_post_ra>
